<compile_context>
chip_gen: v7x
topology: tpu7x:2x2x1
jax: 0.10.0
libtpu: 0.0.40
codegen_flags: <defaults>
</compile_context>

<pallas_src>
import math

import jax
import jax.numpy as jnp
from jax.experimental import pallas as pl
from jax.experimental.pallas import tpu as pltpu


def _layer_scale_kernel(x_ref, gamma_ref, o_ref):
    # Pure VPU elementwise: (tm, tn) * (1, tn) broadcast multiply.
    o_ref[...] = x_ref[...] * gamma_ref[...]


# ~4 MiB of x per block: with double-buffered input + output blocks that is
# ~16 MiB of VMEM -> fits the scoped budget on v5e/v6e/v7x.
_BLOCK_BYTES = 4 * 1024 * 1024
_VMEM_LIMIT = 32 * 1024 * 1024


def _round_up(a, b):
    return (a + b - 1) // b * b


def layer_scale(x, gamma):
    """LayerScale forward: out = x * gamma, gamma shape (D,), broadcast on last axis."""
    D = gamma.shape[0]
    assert x.shape[-1] == D, "last dim of x must match gamma"
    orig_shape = x.shape
    # Keep the hot-path multiply in x's dtype (matches the fp32 module exactly;
    # for bf16 x, torch type promotion would give fp32 output instead).
    gamma = gamma.astype(x.dtype)

    if x.size == 0:
        return x

    x2 = x.reshape(-1, D)                       # (M, D) -- free metadata reshape
    M = x2.shape[0]
    itemsize = x2.dtype.itemsize
    sub = 8 * max(1, 4 // itemsize)             # sublane packing: 8 f32 / 16 bf16 / 32 i8

    # ---- lane-dense layout: fold k rows into the lane axis so the block's last
    # dim is a multiple of 128 (full, unmasked vector stores / dense DMA words).
    # Only fold when it pays off (small D) and there is at least one full group.
    k = 1
    if D % 128 != 0:
        k_cand = math.lcm(D, 128) // D          # <= 128
        if (k_cand * D) * itemsize <= _BLOCK_BYTES // 8 and M >= k_cand:
            k = k_cand
    W = k * D

    # Main (folded) part covers the first M_main rows; the < k leftover rows are
    # computed with a tiny plain-JAX multiply (rare path; avoids padding x).
    M_main = (M // k) * k
    Mw = M_main // k
    x_main = x2 if M_main == M else jax.lax.slice(x2, (0, 0), (M_main, D))
    xw = x_main.reshape(Mw, W)                  # free reshape (contiguous rows)
    gamma_w = jnp.tile(gamma, k).reshape(1, W) if k > 1 else gamma.reshape(1, D)

    # ---- column tile: full width if a sublane-group row block fits the budget,
    # otherwise a multiple-of-128 slab (ragged last column block is masked).
    max_cols = max(128, (_BLOCK_BYTES // (sub * itemsize)) // 128 * 128)
    tn = W if W <= max_cols else max_cols

    # ---- row tile sized against the VMEM budget (multiple of the packing sub),
    # then capped so the grid has >= 4 row steps when the input allows it
    # (v7x megacore sharding + DMA/compute overlap on all generations).
    bytes_per_row = tn * itemsize
    tm = max(sub, (_BLOCK_BYTES // bytes_per_row) // sub * sub)
    tm = min(tm, max(sub, _round_up(pl.cdiv(Mw, 4), sub)))

    grid = (pl.cdiv(Mw, tm), pl.cdiv(W, tn))    # ragged final blocks masked by Pallas

    out_main = pl.pallas_call(
        _layer_scale_kernel,
        out_shape=jax.ShapeDtypeStruct((Mw, W), xw.dtype),
        grid_spec=pltpu.PrefetchScalarGridSpec(
            num_scalar_prefetch=0,
            grid=grid,
            in_specs=[
                pl.BlockSpec((tm, tn), lambda i, j: (i, j)),
                pl.BlockSpec((1, tn), lambda i, j: (0, j)),   # gamma slab, VMEM resident
            ],
            out_specs=pl.BlockSpec((tm, tn), lambda i, j: (i, j)),
        ),
        compiler_params=pltpu.CompilerParams(
            dimension_semantics=("parallel", "parallel"),
            vmem_limit_bytes=_VMEM_LIMIT,
        ),
    )(xw, gamma_w)

    out_main = out_main.reshape(M_main, D)      # free reshape back to row layout
    if M_main != M:
        # Rare fold-remainder path: < k rows handled in plain JAX, then joined.
        tail = x2[M_main:] * gamma
        out2 = jnp.concatenate([out_main, tail], axis=0)
    else:
        out2 = out_main
    return out2.reshape(orig_shape)


if __name__ == "__main__":
    key = jax.random.PRNGKey(0)
    B, N, D = 2, 8, 32
    init_values = 1e-5

    x = jax.random.normal(key, (B, N, D), dtype=jnp.float32)
    # Deterministic parameter init, matching nn.Parameter(init_values * torch.ones(dim)).
    gamma = jnp.full((D,), init_values, dtype=jnp.float32)

    out = layer_scale(x, gamma)
    jax.block_until_ready(out)

    # Correctness check against the plain-JAX reference (same semantics as x * gamma).
    ref = x * gamma
    assert out.shape == x.shape and out.dtype == x.dtype
    assert jnp.allclose(out, ref, rtol=1e-6, atol=1e-6)
    print("KERNEL_OK")
</pallas_src>

<mosaic_0001>
module attributes {stable_mosaic.version = 11 : i64} {
  func.func @_layer_scale_kernel(%arg0: i32, %arg1: i32, %arg2: memref<8x128xf32, #tpu.memory_space<vmem>>, %arg3: memref<1x128xf32, #tpu.memory_space<vmem>>, %arg4: memref<8x128xf32, #tpu.memory_space<vmem>>) attributes {dimension_semantics = [#tpu.dimension_semantics<parallel>, #tpu.dimension_semantics<parallel>], iteration_bounds = array<i64: 1, 1>, scalar_prefetch = 0 : i64, scratch_operands = 0 : i64, tpu.core_type = #tpu.core_type<tc>, window_params = [{transform_indices = @transform_0, window_bounds = array<i64: 8, 128>}, {transform_indices = @transform_1, window_bounds = array<i64: 1, 128>}, {transform_indices = @transform_2, window_bounds = array<i64: 8, 128>}]} {
    %c0 = arith.constant 0 : index
    %c0_0 = arith.constant 0 : index
    %0 = vector.load %arg2[%c0, %c0_0] : memref<8x128xf32, #tpu.memory_space<vmem>>, vector<8x128xf32>
    %c0_1 = arith.constant 0 : index
    %c0_2 = arith.constant 0 : index
    %1 = vector.load %arg3[%c0_1, %c0_2] : memref<1x128xf32, #tpu.memory_space<vmem>>, vector<1x128xf32>
    %2 = vector.broadcast %1 : vector<1x128xf32> to vector<8x128xf32>
    %3 = arith.mulf %0, %2 : vector<8x128xf32>
    %c0_3 = arith.constant 0 : index
    %c0_4 = arith.constant 0 : index
    %4 = vector.load %arg4[%c0_3, %c0_4] : memref<8x128xf32, #tpu.memory_space<vmem>>, vector<8x128xf32>
    tpu.vector_store %arg4[%c0_3, %c0_4], %3 {strides = array<i32>} : memref<8x128xf32, #tpu.memory_space<vmem>>, vector<8x128xf32>,
    return
  }
  func.func @transform_0(%arg0: i32, %arg1: i32) -> (i32, i32) {
    %c0_i32 = arith.constant 0 : i32
    return %arg0, %arg1 : i32, i32
  }
  func.func @transform_1(%arg0: i32, %arg1: i32) -> (i32, i32) {
    %c0_i32 = arith.constant 0 : i32
    %c0_i32_0 = arith.constant 0 : i32
    return %c0_i32, %arg1 : i32, i32
  }
  func.func @transform_2(%arg0: i32, %arg1: i32) -> (i32, i32) {
    %c0_i32 = arith.constant 0 : i32
    return %arg0, %arg1 : i32, i32
  }
}

</mosaic_0001>

<bundles_post_ra>
// kernel: tpu_custom_call.1
= control target key start
LH: loop header
LB: loop body
LE: loop exit
PB: predicated region body
PF: predicated region fallthrough
CT: control target
= control target key end

     0   :  { %7 = vsyncpa [#allocation3], 0  ;;  %s152_s0 = inlined_call_operand.hbm [shape: f32[4,128], index: 0, kind: input, shape index: {}]   ;;  %s153_s1 = inlined_call_operand.vmem [shape: f32[1,128], index: 1, kind: input, shape index: {}]   ;;  %s154_s2 = inlined_call_operand.hbm [shape: f32[4,128], index: 2, kind: output, shape index: {}]  }
   0x1   :  { %8 = vsyncpa [#allocation4], 0 }
   0x2   :  { %13 = vsyncadd [#allocation3], 64  ;;  %s106_s9 = smov [#allocation2]   ;;  %s58_s13 = scalar_lea.hbm %s152_s0, 64 }
   0x3   :  { %s14_s10 = sshll.u32 %s106_s9, 4  ;;  %p59_p0 = scmp.ne.s32.totalorder %s152_s0, %s58_s13  ;;  %s15_s10 = int_to_ptr.vmem [resolvable:$true] %s14_s10 }
   0x4   :  { %p62_p1 = scmp.lt.u32.totalorder %s58_s13, %s152_s0 }
   0x6   :  { %p64_p2 = pnand %p62_p1, %p59_p0 }
   0x8   :  { %67 = shalt.err (!%p64_p2)
}
   0x9   :  { %s68_s18 = scalar_lea.vmem %s15_s10, 64  ;;  %s72_s19 = scalar_lea.vmem %s15_s10, 128 }
   0xa   :  { %p69_p3 = scmp.ne.s32.totalorder %s15_s10, %s68_s18  ;;  %p73_p4 = scmp.lt.s32.totalorder %s15_s10, %s15_s10 }
   0xb   :  { %p74_p5 = scmp.lt.s32.totalorder %s72_s19, %s68_s18 }
   0xd   :  { %p75_p6 = por %p74_p5, %p73_p4 }
   0xf   :  { %p76_p7 = pnand %p75_p6, %p69_p3 }
  0x11   :  { %79 = shalt.err (!%p76_p7)
}
  0x12   :  { %s107_s20 = smov 64   ;;  %s108_s21 = smov 4  }
  0x13   :  { %20 = dma.hbm_to_vmem [thread:$0]  %s152_s0, 64, %s15_s10, [#allocation3], %s107_s20, %s107_s20, %s108_s21  }
  0x14   :  { %102 = dma.done.wait [#allocation3], 128  }
  0x15   :  { %103 = vsyncadd [#allocation3], 4294967168  ;;  %v26_v0 = vld [vmem:[#allocation2] sm:$0xff] }
  0x16   :  { %v53_v1 = vld [vmem:[%s153_s1] ss:$0 sm:$0xff] }
  0x17   :  { %v34_v2 = vmul.f32 %v53_v1, %v26_v0 }
  0x19   :  { %35 = vst [vmem:[#allocation5] sm:$0xff] %v34_v2 }
  0x1a   :  { %40 = vsyncadd [#allocation4], 64  ;;  %s109_s26 = smov [#allocation5]  }
  0x1b   :  { %s41_s27 = sshll.u32 %s109_s26, 4  ;;  %s42_s27 = int_to_ptr.vmem [resolvable:$true] %s41_s27 }
  0x1c   :  { %s80_s28 = scalar_lea.vmem %s42_s27, 64  ;;  %s84_s29 = scalar_lea.vmem %s42_s27, 128 }
  0x1d   :  { %p81_p8 = scmp.ne.s32.totalorder %s42_s27, %s80_s28  ;;  %p85_p9 = scmp.lt.s32.totalorder %s42_s27, %s42_s27 }
  0x1e   :  { %p86_p10 = scmp.lt.s32.totalorder %s84_s29, %s80_s28 }
  0x20   :  { %p87_p11 = por %p86_p10, %p85_p9 }
  0x22   :  { %p88_p12 = pnand %p87_p11, %p81_p8 }
  0x24   :  { %91 = shalt.err (!%p88_p12)
}
  0x25   :  { %s92_s3 = scalar_lea.hbm %s154_s2, 64 }
  0x26   :  { %p93_p13 = scmp.ne.s32.totalorder %s154_s2, %s92_s3  ;;  %p96_p0 = scmp.lt.u32.totalorder %s92_s3, %s154_s2 }
  0x28   :  { %p98_p1 = pnand %p96_p0, %p93_p13 }
  0x2a   :  { %101 = shalt.err (!%p98_p1)
}
  0x2b   :  { %47 = dma.vmem_to_hbm [thread:$0]  %s42_s27, 64, %s154_s2, [#allocation4], %s107_s20, %s107_s20, %s108_s21  }
  0x2c   :  { %104 = dma.done.wait [#allocation4], 128  }
  0x2d   :  { %105 = vsyncadd [#allocation4], 4294967168 }
  0x2e   :  { %51 = vsyncpa [#allocation3], 1 }
  0x2f   :  { %52 = vsyncpa [#allocation4], 1 }

</bundles_post_ra>
